<compile_context>
chip_gen: v7x
topology: tpu7x:2x2x1
jax: 0.10.0
libtpu: 0.0.40
codegen_flags: <defaults>
</compile_context>

<pallas_src>
import jax
import jax.numpy as jnp
from jax.experimental import pallas as pl
from jax.experimental.pallas import tpu as pltpu


def cold_kernel(xall_ref, l_ref, r_ref, w1a_ref, w1b_ref, b1_ref,
                w2_ref, b2_ref, w3r_ref, b3_ref, out_ref):
    # Layer 1: user+item embedding part and pairwise-inner-product part, both
    # as lane-dense MXU matmuls with f32 accumulation.
    z1 = jnp.dot(xall_ref[...], w1a_ref[...],
                 preferred_element_type=jnp.float32)            # (TB, h1)
    z1 = z1 + jnp.dot(l_ref[...] * r_ref[...], w1b_ref[...],
                      preferred_element_type=jnp.float32)       # cross on MXU
    a1 = jnp.maximum(z1 + b1_ref[...], 0.0)                     # (TB, h1)

    z2 = jnp.dot(a1, w2_ref[...],
                 preferred_element_type=jnp.float32) + b2_ref[...]
    a2 = jnp.maximum(z2, 0.0)                                   # (TB, h2)

    # Final h2 -> 1 projection as a contraction over the last dim of both
    # operands (same pattern as q @ k.T in decode attention) so the result is
    # already a lane-dense (1, TB) row.
    z3 = jax.lax.dot_general(
        w3r_ref[...], a2,
        dimension_numbers=(((1,), (1,)), ((), ())),
        preferred_element_type=jnp.float32)                     # (1, TB)
    out_ref[...] = z3 + b3_ref[...]


def _pick_tile(batch, tile_b):
    """Sublane-aligned batch tile; keep >= 2 grid steps when batch allows."""
    tb = max(8, min(int(tile_b), batch))
    tb = ((tb + 7) // 8) * 8
    if pl.cdiv(batch, tb) < 2 and batch > 8:
        tb = ((pl.cdiv(batch, 2) + 7) // 8) * 8
    return tb


def cold_forward(params, x_user, x_item, x_stat, *, tile_b=512):
    table = params["embedding"]
    E = table.shape[1]
    B, U = x_user.shape
    I = x_item.shape[1]
    S = x_stat.shape[1]
    F = U + I + S
    ui_dim = (U + I) * E
    P = F * (F - 1) // 2

    TB = _pick_tile(B, tile_b)
    G = pl.cdiv(B, TB)
    Bp = G * TB

    # ---- XLA glue: gather + lane-dense views (pad ragged batch) ------------
    x = jnp.concatenate([x_user, x_item, x_stat], axis=1)       # (B, F)
    if Bp != B:
        x = jnp.pad(x, ((0, Bp - B), (0, 0)))                   # index 0 pad rows
    all_emb = table[x].astype(jnp.float32)                      # (Bp, F, E)
    all_flat = all_emb.reshape(Bp, F * E)                       # lane-dense

    row, col = [], []
    for i in range(F - 1):
        for j in range(i + 1, F):
            row.append(i)
            col.append(j)
    row = jnp.asarray(row, dtype=jnp.int32)
    col = jnp.asarray(col, dtype=jnp.int32)
    lhs = all_emb[:, row, :].reshape(Bp, P * E)                 # (Bp, P*E)
    rhs = all_emb[:, col, :].reshape(Bp, P * E)                 # (Bp, P*E)

    # ---- weight prep --------------------------------------------------------
    h1 = params["w1"].shape[1]
    w1_ui = params["w1"][:ui_dim]                               # ((U+I)*E, h1)
    w1_cross = params["w1"][ui_dim:]                            # (P, h1)
    # zero rows for the stat fields so all_flat @ w1a == ui_flat @ w1_ui
    w1a = jnp.concatenate(
        [w1_ui, jnp.zeros((S * E, h1), jnp.float32)], axis=0)   # (F*E, h1)
    # repeat each cross-row E times so (L*R) @ w1b == cross @ w1_cross
    w1b = jnp.repeat(w1_cross, E, axis=0)                       # (P*E, h1)
    w3r = params["w3"].T                                        # (1, h2)

    def resident(a):
        return pl.BlockSpec(a.shape, lambda i, _nd=a.ndim: (0,) * _nd)

    out = pl.pallas_call(
        cold_kernel,
        out_shape=jax.ShapeDtypeStruct((G, 1, TB), jnp.float32),
        grid=(G,),
        in_specs=[pl.BlockSpec((TB, F * E), lambda i: (i, 0)),
                  pl.BlockSpec((TB, P * E), lambda i: (i, 0)),
                  pl.BlockSpec((TB, P * E), lambda i: (i, 0)),
                  resident(w1a), resident(w1b), resident(params["b1"]),
                  resident(params["w2"]), resident(params["b2"]),
                  resident(w3r), resident(params["b3"])],
        out_specs=pl.BlockSpec((None, 1, TB), lambda i: (i, 0, 0)),
        compiler_params=pltpu.CompilerParams(
            dimension_semantics=("parallel",),
            vmem_limit_bytes=32 * 1024 * 1024),
    )(all_flat, lhs, rhs, w1a, w1b, params["b1"],
      params["w2"], params["b2"], w3r, params["b3"])

    return out.reshape(Bp, 1)[:B]


def init_params(key, vocab, embed_dim, user_nf, item_nf, stat_nf, hidden_dims):
    F = user_nf + item_nf + stat_nf
    ui_dim = (user_nf + item_nf) * embed_dim
    cross_dim = F * (F - 1) // 2
    in_dim = ui_dim + cross_dim
    h1, h2 = hidden_dims
    ks = jax.random.split(key, 7)

    def init(k, shape, scale=0.1):
        return scale * jax.random.normal(k, shape, jnp.float32)

    return {
        "embedding": init(ks[0], (vocab, embed_dim)),
        "w1": init(ks[1], (in_dim, h1)),
        "b1": init(ks[2], (1, h1)),
        "w2": init(ks[3], (h1, h2)),
        "b2": init(ks[4], (1, h2)),
        "w3": init(ks[5], (h2, 1)),
        "b3": init(ks[6], (1, 1)),
    }


def reference_forward(params, x_user, x_item, x_stat):
    """Pure-JAX reference matching the torch COLD semantics."""
    table = params["embedding"]
    B = x_user.shape[0]
    x = jnp.concatenate([x_user, x_item, x_stat], axis=1)
    user_emb = table[x_user].reshape(B, -1)
    item_emb = table[x_item].reshape(B, -1)
    all_emb = table[x]                                          # (B, F, E)
    F = all_emb.shape[1]
    row, col = [], []
    for i in range(F - 1):
        for j in range(i + 1, F):
            row.append(i)
            col.append(j)
    cross = jnp.sum(all_emb[:, row, :] * all_emb[:, col, :], axis=2)
    feats = jnp.concatenate([user_emb, item_emb, cross],
                            axis=1).astype(jnp.float32)
    z1 = feats @ params["w1"] + params["b1"]
    a1 = jnp.maximum(z1, 0.0)
    z2 = a1 @ params["w2"] + params["b2"]
    a2 = jnp.maximum(z2, 0.0)
    return a2 @ params["w3"] + params["b3"]


if __name__ == "__main__":
    key = jax.random.PRNGKey(0)
    vocab, embed_dim = 100, 8
    user_nf, item_nf, stat_nf = 2, 2, 2          # num_fields = 6, P = 15
    hidden_dims = [32, 16]
    B = 64                                       # -> TB=32, grid=(2,)

    kp, ki = jax.random.split(key)
    params = init_params(kp, vocab, embed_dim, user_nf, item_nf, stat_nf,
                         hidden_dims)

    k1, k2, k3 = jax.random.split(ki, 3)
    x_user = jax.random.randint(k1, (B, user_nf), 0, vocab)
    x_item = jax.random.randint(k2, (B, item_nf), 0, vocab)
    x_stat = jax.random.randint(k3, (B, stat_nf), 0, vocab)

    out = jax.block_until_ready(cold_forward(params, x_user, x_item, x_stat))
    ref = reference_forward(params, x_user, x_item, x_stat)
    assert out.shape == (B, 1)
    assert jnp.allclose(out, ref, atol=1e-4, rtol=1e-4), (out, ref)

    # Ragged batch (B % tile != 0) exercises the wrapper padding path.
    B2 = 37
    out2 = jax.block_until_ready(
        cold_forward(params, x_user[:B2], x_item[:B2], x_stat[:B2]))
    ref2 = reference_forward(params, x_user[:B2], x_item[:B2], x_stat[:B2])
    assert out2.shape == (B2, 1)
    assert jnp.allclose(out2, ref2, atol=1e-4, rtol=1e-4), (out2, ref2)

    print("KERNEL_OK")
</pallas_src>

<mosaic_0001>
module attributes {stable_mosaic.version = 11 : i64} {
  func.func @cold_kernel(%arg0: i32, %arg1: memref<32x48xf32, #tpu.memory_space<vmem>>, %arg2: memref<32x120xf32, #tpu.memory_space<vmem>>, %arg3: memref<32x120xf32, #tpu.memory_space<vmem>>, %arg4: memref<48x32xf32, #tpu.memory_space<vmem>>, %arg5: memref<120x32xf32, #tpu.memory_space<vmem>>, %arg6: memref<1x32xf32, #tpu.memory_space<vmem>>, %arg7: memref<32x16xf32, #tpu.memory_space<vmem>>, %arg8: memref<1x16xf32, #tpu.memory_space<vmem>>, %arg9: memref<1x16xf32, #tpu.memory_space<vmem>>, %arg10: memref<1x1xf32, #tpu.memory_space<vmem>>, %arg11: memref<1x1x32xf32, #tpu.memory_space<vmem>>) attributes {dimension_semantics = [#tpu.dimension_semantics<parallel>], iteration_bounds = array<i64: 2>, scalar_prefetch = 0 : i64, scratch_operands = 0 : i64, tpu.core_type = #tpu.core_type<tc>, window_params = [{transform_indices = @transform_0, window_bounds = array<i64: 32, 48>}, {transform_indices = @transform_1, window_bounds = array<i64: 32, 120>}, {transform_indices = @transform_2, window_bounds = array<i64: 32, 120>}, {pipeline_mode = #tpu.pipeline_mode<synchronous>, transform_indices = @transform_3, window_bounds = array<i64: 48, 32>}, {pipeline_mode = #tpu.pipeline_mode<synchronous>, transform_indices = @transform_4, window_bounds = array<i64: 120, 32>}, {pipeline_mode = #tpu.pipeline_mode<synchronous>, transform_indices = @transform_5, window_bounds = array<i64: 1, 32>}, {pipeline_mode = #tpu.pipeline_mode<synchronous>, transform_indices = @transform_6, window_bounds = array<i64: 32, 16>}, {pipeline_mode = #tpu.pipeline_mode<synchronous>, transform_indices = @transform_7, window_bounds = array<i64: 1, 16>}, {pipeline_mode = #tpu.pipeline_mode<synchronous>, transform_indices = @transform_8, window_bounds = array<i64: 1, 16>}, {pipeline_mode = #tpu.pipeline_mode<synchronous>, transform_indices = @transform_9, window_bounds = array<i64: 1, 1>}, {transform_indices = @transform_10, window_bounds = array<i64: 1, 1, 32>}]} {
    %c0 = arith.constant 0 : index
    %c0_0 = arith.constant 0 : index
    %0 = vector.load %arg1[%c0, %c0_0] : memref<32x48xf32, #tpu.memory_space<vmem>>, vector<32x48xf32>
    %c0_1 = arith.constant 0 : index
    %c0_2 = arith.constant 0 : index
    %1 = vector.load %arg4[%c0_1, %c0_2] : memref<48x32xf32, #tpu.memory_space<vmem>>, vector<48x32xf32>
    %cst = arith.constant dense<0.000000e+00> : vector<32x32xf32>
    %2 = tpu.matmul %0, %1, %cst {dimension_numbers = #tpu.dot_dimension_numbers<[1], [0], [0], [1], [0, 0, 1, 1], [], []>} : vector<32x48xf32>, vector<48x32xf32>, vector<32x32xf32> -> vector<32x32xf32>
    %c0_3 = arith.constant 0 : index
    %c0_4 = arith.constant 0 : index
    %3 = vector.load %arg2[%c0_3, %c0_4] : memref<32x120xf32, #tpu.memory_space<vmem>>, vector<32x120xf32>
    %c0_5 = arith.constant 0 : index
    %c0_6 = arith.constant 0 : index
    %4 = vector.load %arg3[%c0_5, %c0_6] : memref<32x120xf32, #tpu.memory_space<vmem>>, vector<32x120xf32>
    %5 = arith.mulf %3, %4 : vector<32x120xf32>
    %c0_7 = arith.constant 0 : index
    %c0_8 = arith.constant 0 : index
    %6 = vector.load %arg5[%c0_7, %c0_8] : memref<120x32xf32, #tpu.memory_space<vmem>>, vector<120x32xf32>
    %cst_9 = arith.constant dense<0.000000e+00> : vector<32x32xf32>
    %7 = tpu.matmul %5, %6, %cst_9 {dimension_numbers = #tpu.dot_dimension_numbers<[1], [0], [0], [1], [0, 0, 1, 1], [], []>} : vector<32x120xf32>, vector<120x32xf32>, vector<32x32xf32> -> vector<32x32xf32>
    %8 = arith.addf %2, %7 : vector<32x32xf32>
    %c0_10 = arith.constant 0 : index
    %c0_11 = arith.constant 0 : index
    %9 = vector.load %arg6[%c0_10, %c0_11] : memref<1x32xf32, #tpu.memory_space<vmem>>, vector<1x32xf32>
    %10 = vector.broadcast %9 : vector<1x32xf32> to vector<32x32xf32>
    %11 = arith.addf %8, %10 : vector<32x32xf32>
    %cst_12 = arith.constant 0.000000e+00 : f32
    %12 = vector.broadcast %cst_12 : f32 to vector<32x32xf32>
    %13 = arith.maximumf %11, %12 : vector<32x32xf32>
    %c0_13 = arith.constant 0 : index
    %c0_14 = arith.constant 0 : index
    %14 = vector.load %arg7[%c0_13, %c0_14] : memref<32x16xf32, #tpu.memory_space<vmem>>, vector<32x16xf32>
    %cst_15 = arith.constant dense<0.000000e+00> : vector<32x16xf32>
    %15 = tpu.matmul %13, %14, %cst_15 {dimension_numbers = #tpu.dot_dimension_numbers<[1], [0], [0], [1], [0, 0, 1, 1], [], []>} : vector<32x32xf32>, vector<32x16xf32>, vector<32x16xf32> -> vector<32x16xf32>
    %c0_16 = arith.constant 0 : index
    %c0_17 = arith.constant 0 : index
    %16 = vector.load %arg8[%c0_16, %c0_17] : memref<1x16xf32, #tpu.memory_space<vmem>>, vector<1x16xf32>
    %17 = vector.broadcast %16 : vector<1x16xf32> to vector<32x16xf32>
    %18 = arith.addf %15, %17 : vector<32x16xf32>
    %cst_18 = arith.constant 0.000000e+00 : f32
    %19 = vector.broadcast %cst_18 : f32 to vector<32x16xf32>
    %20 = arith.maximumf %18, %19 : vector<32x16xf32>
    %c0_19 = arith.constant 0 : index
    %c0_20 = arith.constant 0 : index
    %21 = vector.load %arg9[%c0_19, %c0_20] : memref<1x16xf32, #tpu.memory_space<vmem>>, vector<1x16xf32>
    %cst_21 = arith.constant dense<0.000000e+00> : vector<1x32xf32>
    %22 = tpu.matmul %21, %20, %cst_21 {dimension_numbers = #tpu.dot_dimension_numbers<[1], [1], [0], [0], [0, 0, 1, 0], [], []>} : vector<1x16xf32>, vector<32x16xf32>, vector<1x32xf32> -> vector<1x32xf32>
    %c0_22 = arith.constant 0 : index
    %c0_23 = arith.constant 0 : index
    %23 = vector.load %arg10[%c0_22, %c0_23] : memref<1x1xf32, #tpu.memory_space<vmem>>, vector<1x1xf32>
    %24 = vector.broadcast %23 : vector<1x1xf32> to vector<1x32xf32>
    %25 = arith.addf %22, %24 : vector<1x32xf32>
    %c0_24 = arith.constant 0 : index
    %c0_25 = arith.constant 0 : index
    %c0_26 = arith.constant 0 : index
    %26 = vector.load %arg11[%c0_24, %c0_25, %c0_26] : memref<1x1x32xf32, #tpu.memory_space<vmem>>, vector<1x1x32xf32>
    %27 = vector.shape_cast %26 : vector<1x1x32xf32> to vector<1x32xf32>
    %28 = vector.shape_cast %25 : vector<1x32xf32> to vector<1x1x32xf32>
    tpu.vector_store %arg11[%c0_24, %c0_25, %c0_26], %28 {strides = array<i32>} : memref<1x1x32xf32, #tpu.memory_space<vmem>>, vector<1x1x32xf32>,
    return
  }
  func.func @transform_0(%arg0: i32) -> (i32, i32) {
    %c0_i32 = arith.constant 0 : i32
    %c0_i32_0 = arith.constant 0 : i32
    return %arg0, %c0_i32 : i32, i32
  }
  func.func @transform_1(%arg0: i32) -> (i32, i32) {
    %c0_i32 = arith.constant 0 : i32
    %c0_i32_0 = arith.constant 0 : i32
    return %arg0, %c0_i32 : i32, i32
  }
  func.func @transform_2(%arg0: i32) -> (i32, i32) {
    %c0_i32 = arith.constant 0 : i32
    %c0_i32_0 = arith.constant 0 : i32
    return %arg0, %c0_i32 : i32, i32
  }
  func.func @transform_3(%arg0: i32) -> (i32, i32) {
    %c0_i32 = arith.constant 0 : i32
    %c0_i32_0 = arith.constant 0 : i32
    %c0_i32_1 = arith.constant 0 : i32
    return %c0_i32, %c0_i32_0 : i32, i32
  }
  func.func @transform_4(%arg0: i32) -> (i32, i32) {
    %c0_i32 = arith.constant 0 : i32
    %c0_i32_0 = arith.constant 0 : i32
    %c0_i32_1 = arith.constant 0 : i32
    return %c0_i32, %c0_i32_0 : i32, i32
  }
  func.func @transform_5(%arg0: i32) -> (i32, i32) {
    %c0_i32 = arith.constant 0 : i32
    %c0_i32_0 = arith.constant 0 : i32
    %c0_i32_1 = arith.constant 0 : i32
    return %c0_i32, %c0_i32_0 : i32, i32
  }
  func.func @transform_6(%arg0: i32) -> (i32, i32) {
    %c0_i32 = arith.constant 0 : i32
    %c0_i32_0 = arith.constant 0 : i32
    %c0_i32_1 = arith.constant 0 : i32
    return %c0_i32, %c0_i32_0 : i32, i32
  }
  func.func @transform_7(%arg0: i32) -> (i32, i32) {
    %c0_i32 = arith.constant 0 : i32
    %c0_i32_0 = arith.constant 0 : i32
    %c0_i32_1 = arith.constant 0 : i32
    return %c0_i32, %c0_i32_0 : i32, i32
  }
  func.func @transform_8(%arg0: i32) -> (i32, i32) {
    %c0_i32 = arith.constant 0 : i32
    %c0_i32_0 = arith.constant 0 : i32
    %c0_i32_1 = arith.constant 0 : i32
    return %c0_i32, %c0_i32_0 : i32, i32
  }
  func.func @transform_9(%arg0: i32) -> (i32, i32) {
    %c0_i32 = arith.constant 0 : i32
    %c0_i32_0 = arith.constant 0 : i32
    %c0_i32_1 = arith.constant 0 : i32
    return %c0_i32, %c0_i32_0 : i32, i32
  }
  func.func @transform_10(%arg0: i32) -> (i32, i32, i32) {
    %c0_i32 = arith.constant 0 : i32
    %c0_i32_0 = arith.constant 0 : i32
    %c0_i32_1 = arith.constant 0 : i32
    return %arg0, %c0_i32, %c0_i32_0 : i32, i32, i32
  }
}

</mosaic_0001>

<bundles_post_ra>
// kernel: tpu_custom_call.1
= control target key start
LH: loop header
LB: loop body
LE: loop exit
PB: predicated region body
PF: predicated region fallthrough
CT: control target
= control target key end

     0   :  { %s1559_s0 = inlined_call_operand.vmem [shape: f32[64,48], index: 0, kind: input, shape index: {}]   ;;  %s1560_s1 = inlined_call_operand.vmem [shape: f32[64,120], index: 1, kind: input, shape index: {}]   ;;  %s1561_s2 = inlined_call_operand.vmem [shape: f32[64,120], index: 2, kind: input, shape index: {}]   ;;  %s1562_s3 = inlined_call_operand.vmem [shape: f32[48,32], index: 3, kind: input, shape index: {}]   ;;  %s1563_s4 = inlined_call_operand.vmem [shape: f32[120,32], index: 4, kind: input, shape index: {}]   ;;  %s1564_s5 = inlined_call_operand.vmem [shape: f32[1,32], index: 5, kind: input, shape index: {}]   ;;  %s1565_s6 = inlined_call_operand.vmem [shape: f32[32,16], index: 6, kind: input, shape index: {}]   ;;  %s1566_s7 = inlined_call_operand.vmem [shape: f32[1,16], index: 7, kind: input, shape index: {}]   ;;  %s1567_s8 = inlined_call_operand.vmem [shape: f32[1,16], index: 8, kind: input, shape index: {}]   ;;  %s1568_s9 = inlined_call_operand.<no memory space> [shape: f32[1,1], index: 9, kind: input, shape index: {}]   ;;  %s1569_s10 = inlined_call_operand.hbm [shape: f32[2,1,32], index: 10, kind: output, shape index: {}]  }
   0x1   :  { %v15_v0 = vstv %s1568_s9 }
   0x2   :  { %16 = vst [vmem:[#allocation2] sm:$0x1] %v15_v0 }
   0x3   :  { %17 = vsyncpa [#allocation4], 0 }
   0x4   :  { %19 = vsyncpa [#allocation4 + $0x1], 0  ;;  %s1341_s15 = smov 0   ;;  %s1343_s16 = smov 0  }
   0x5   :  { %s1345_s17 = smov 0   ;;  %s1347_s18 = smov 0  }
   0x6 LB: > { %s1362_s9 = sadd.s32 4294967295, %s1276_s18   ;;  %s957_s19 = sadd.s32 4294967294, %s1276_s18   ;;  %s1276_s18 = sphi %s1347_s18, %s1575_s18   ;;  %s1272_s17 = sphi %s1345_s17, %s1574_s17   ;;  %s1268_s16 = sphi %s1343_s16, %s1573_s16   ;;  %s1264_s15 = sphi %s1341_s15, %s1572_s15  }
   0x7   : > { %s1366_s20 = sadd.s32 1, %s1276_s18   ;;  %s257_s21 = sadd.s32 1, %s1272_s17 }
   0x8   : > { %s254_s22 = ssub.s32 %s1276_s18, %s1366_s20  ;;  %p267_p0 = scmp.ne.s32.totalorder %s1272_s17, %s1268_s16 }
   0x9   : > { %p255_p1 = scmp.eq.s32.totalorder %s254_s22, 0  ;;  %p268_p2 = scmp.eq.s32.totalorder %s1362_s9, 1 }
   0xa   : > { %p273_p3 = scmp.ne.s32.totalorder %s1268_s16, %s1264_s15  ;;  %p274_p4 = scmp.eq.s32.totalorder %s957_s19, 1 }
   0xb   : > { %s1377_s23 = scalar_select %p255_p1, %s1272_s17, %s257_s21  }
   0xc   : > { %p1379_p5 = por %p268_p2, %p267_p0  ;;  %p1383_p6 = por %p274_p4, %p273_p3 }
   0xd   : > { %p960_p7 = scmp.ge.s32.totalorder %s1276_s18, 1  ;;  %p340_p8 = scmp.lt.s32.totalorder %s1276_s18, 3 }
   0xf   : > { %p341_p9 = pnand %p960_p7, %p340_p8 }
  0x10   : > { %v427_v1 = vld [vmem:[%s1563_s4] sm:$0xff] (!%p341_p9)  ;;  %v428_v2 = vld [vmem:[%s1563_s4 + $0x8] sm:$0xff] (!%p341_p9)  ;;  %v429_v3 = vld [vmem:[%s1563_s4 + $0x10] sm:$0xff] (!%p341_p9)  ;;  %s961_s12 = sshll.u32 (!%p341_p9), %s1362_s9, 2  ;;  %vm540_vm0 = vcmask (!%p341_p9), 392192   ;;  %vm442_vm1 = vcmask (!%p341_p9), 982016  }
  0x11   : > { %344 = sbr.rel (%p341_p9) target bundleno = 731 (0x2db), region = 60  ;;  %v1110_v4 = vpack.c.bf16 (!%p341_p9), %v428_v2, %v427_v1  ;;  %v430_v5 = vld [vmem:[%s1563_s4 + $0x18] sm:$0xff] (!%p341_p9)  ;;  %p388_p10 = scmp.lt.s32.totalorder (!%p341_p9), %s961_s12, 7  ;;  %v431_v7 = vld [vmem:[%s1563_s4 + $0x20] sm:$0xff] (!%p341_p9)  ;;  %v432_v8 = vld [vmem:[%s1563_s4 + $0x28] sm:$0xff] (!%p341_p9)  ;;  %vm664_vm2 = vcmask (!%p341_p9), 261120  }
  0x12   : > { %v1114_v6 = vpack.c.bf16 (!%p341_p9), %v430_v5, %v429_v3  ;;  %v409_v9 = vld [vmem:[%s1562_s3] sm:$0xff] (!%p341_p9)  ;;  %v410_v10 = vld [vmem:[%s1562_s3 + $0x8] sm:$0xff] (!%p341_p9)  ;;  %v411_v12 = vld [vmem:[%s1562_s3 + $0x10] sm:$0xff] (!%p341_p9)  ;;  %v1118_v13 = vpack.c.bf16 (!%p341_p9), %v432_v8, %v431_v7  ;;  %vm1279_vm3 = vmmov (!%p341_p9), 0   ;;  %vm777_vm4 = vcmask (!%p341_p9), 130048   ;;  %s385_s22 = sand.u32 (!%p341_p9), 1, %s1268_s16  }
  0x13   : > { %1111 = vmatprep.subr.bf16.mxu0 (!%p341_p9), %v1110_v4  ;;  %v1138_v11 = vpack.c.bf16 (!%p341_p9), %v410_v10, %v409_v9  ;;  %v433_v14 = vld [vmem:[%s1563_s4 + $0x30] sm:$0xff] (!%p341_p9)  ;;  %v412_v15 = vld [vmem:[%s1562_s3 + $0x18] sm:$0xff] (!%p341_p9)  ;;  %v413_v18 = vld [vmem:[%s1562_s3 + $0x20] sm:$0xff] (!%p341_p9)  ;;  %s986_s28 = sshll.u32 (!%p341_p9), %s1362_s9, 4  ;;  %vm863_vm6 = vcmask (!%p341_p9), 253952   ;;  %s1282_s9 = smov (!%p341_p9), [#allocation3]  }
  0x14   : > { %1113 = vmatpush3.bf16.msra.mxu0 (!%p341_p9), %v1110_v4  ;;  %v434_v16 = vld [vmem:[%s1563_s4 + $0x38] sm:$0xff] (!%p341_p9)  ;;  %v1142_v17 = vpack.c.bf16 (!%p341_p9), %v412_v15, %v411_v12  ;;  %v414_v19 = vld [vmem:[%s1562_s3 + $0x28] sm:$0xff] (!%p341_p9)  ;;  %v435_v26 = vld [vmem:[%s1563_s4 + $0x40] sm:$0xff] (!%p341_p9)  ;;  %v1280_v12 = vmov (!%p341_p9), 0.0   ;;  %s1517_s13 = scalar_lea.hbm (!%p341_p9), %s1569_s10, %s986_s28  ;;  %s1218_s19 = sshll.u32 (!%p341_p9), %s1282_s9, 4  ;;  %s1219_s19 = int_to_ptr.vmem [resolvable:$false] %s1218_s19 }
  0x15   : > { %1115 = vmatprep.subr.bf16.mxu0 (!%p341_p9), %v1114_v6  ;;  %1139 = vmatprep.subr.bf16.mxu1 (!%p341_p9), %v1138_v11  ;;  %v1146_v22 = vpack.c.bf16 (!%p341_p9), %v414_v19, %v413_v18  ;;  %v1122_v24 = vpack.c.bf16 (!%p341_p9), %v434_v16, %v433_v14  ;;  %v436_v27 = vld [vmem:[%s1563_s4 + $0x48] sm:$0xff] (!%p341_p9)  ;;  %v437_v29 = vld [vmem:[%s1563_s4 + $0x50] sm:$0xff] (!%p341_p9)  ;;  %v438_v30 = vld [vmem:[%s1563_s4 + $0x58] sm:$0xff] (!%p341_p9)  ;;  %v1281_v14 = vmov (!%p341_p9), 0  }
  0x16   : > { %1141 = vmatpush3.bf16.msra.mxu1 (!%p341_p9), %v1138_v11  ;;  %v1126_v28 = vpack.c.bf16 (!%p341_p9), %v436_v27, %v435_v26  ;;  %v1130_v33 = vpack.c.bf16 (!%p341_p9), %v438_v30, %v437_v29  ;;  %v439_v34 = vld [vmem:[%s1563_s4 + $0x60] sm:$0xff] (!%p341_p9)  ;;  %v440_v35 = vld [vmem:[%s1563_s4 + $0x68] sm:$0xff] (!%p341_p9)  ;;  %v441_v38 = vld [vmem:[%s1563_s4 + $0x70] sm:$0xff] (!%p341_p9)  ;;  %v1278_v11 = vmov (!%p341_p9), 0.0|0.0   ;;  %1213 = vset.pattern.permute.xlu0 (!%p341_p9), %v1281_v14 }
  0x17   : > { %1143 = vmatprep.subr.bf16.mxu1 (!%p341_p9), %v1142_v17  ;;  %v1134_v37 = vpack.c.bf16 (!%p341_p9), %v440_v35, %v439_v34  ;;  %v653_v48 = vld [vmem:[%s1565_s6] sm:$0xff] (!%p341_p9)  ;;  %v654_v49 = vld [vmem:[%s1565_s6 + $0x8] sm:$0xff] (!%p341_p9)  ;;  %v655_v51 = vld [vmem:[%s1565_s6 + $0x10] sm:$0xff] (!%p341_p9) }
  0x18   : > { %s1577_s12 = smov (!%p388_p10, %s961_s12), 7  ;;  %1117 = vmatpush3.bf16.msra.mxu0 %v1114_v6  ;;  %v1150_v50 = vpack.c.bf16 %v654_v49, %v653_v48  ;;  %v656_v52 = vld [vmem:[%s1565_s6 + $0x18] sm:$0xff]  ;;  %v975_v59 = vld [vmem:[%s1564_s5] ss:$0 sm:$0xff]  ;;  %vm1160_vm5 = vmpackc.low %vm777_vm4, %vm777_vm4 }
  0x19   : > { %s962_s26 = sshll.u32 %s1577_s12, 3  ;;  %1119 = vmatprep.subr.bf16.mxu0 %v1118_v13  ;;  %v1154_v53 = vpack.c.bf16 %v656_v52, %v655_v51  ;;  %v976_v15 = vld [vmem:[%s1566_s7] ss:$0 sm:$0xff] }
  0x1a   : > { %s1435_s21 = scalar_lea.vmem %s1559_s0, %s962_s26  ;;  %s1440_s27 = scalar_lea.vmem %s1560_s1, %s962_s26  ;;  %1145 = vmatpush3.bf16.msra.mxu1 %v1142_v17  ;;  %v766_v30 = vld [vmem:[%s1567_s8] sm:$0x1] }
  0x1b   : > { %v405_v20 = vld [vmem:[%s1435_s21] sm:$0xff]  ;;  %s1446_s30 = scalar_lea.vmem %s1561_s2, %s962_s26  ;;  %1147 = vmatprep.subr.bf16.mxu1 %v1146_v22  ;;  %v406_v31 = vld [vmem:[%s1435_s21 + $0x8] sm:$0xff]  ;;  %v407_v32 = vld [vmem:[%s1435_s21 + $0x10] sm:$0xff]  ;;  %s866_s26 = scalar_lea.sflag [#allocation4], %s385_s22 }
  0x1c   : > { %v415_v21 = vld [vmem:[%s1440_s27] sm:$0xff]  ;;  %1079 = vmatprep.mubr.msk.f32.mxu1 %vm540_vm0, %v405_v20  ;;  %1121 = vmatpush3.bf16.msra.mxu0 %v1118_v13  ;;  %v408_v36 = vld [vmem:[%s1435_s21 + $0x18] sm:$0xff]  ;;  %v416_v39 = vld [vmem:[%s1440_s27 + $0x8] sm:$0xff]  ;;  %s1220_s21 = scalar_lea.vmem %s1219_s19, 32 }
  0x1d   : > { %v419_v23 = vld [vmem:[%s1446_s30] sm:$0xff]  ;;  %1123 = vmatprep.subr.bf16.mxu0 %v1122_v24  ;;  %v420_v40 = vld [vmem:[%s1446_s30 + $0x8] sm:$0xff]  ;;  %v417_v41 = vld [vmem:[%s1440_s27 + $0x10] sm:$0xff] }
  0x1e   : > { %v423_v25 = vmul.f32 %v419_v23, %v415_v21  ;;  %1149 = vmatpush3.bf16.msra.mxu1 %v1146_v22  ;;  %v421_v42 = vld [vmem:[%s1446_s30 + $0x10] sm:$0xff]  ;;  %v424_v43 = vmul.f32 %v420_v40, %v416_v39  ;;  %v418_v45 = vld [vmem:[%s1440_s27 + $0x18] sm:$0xff]  ;;  %v767_v13 = vld [vmem:[#allocation2] sm:$0x1]  ;;  %s386_s27 = scalar_lea.vmem [#allocation3], %s385_s22 }
  0x1f   : > { %v425_v44 = vmul.f32 %v421_v42, %v417_v41  ;;  %v422_v46 = vld [vmem:[%s1446_s30 + $0x18] sm:$0xff]  ;;  %1151 = vmatprep.subr.bf16.mxu1 %v1150_v50  ;;  %770 = vperm.xlu0 %1213, %v767_v13   ;;  %s878_s30 = sshll.u32 %s386_s27, 4  ;;  %s1519_s30 = int_to_ptr.vmem [resolvable:$true] %s878_s30 }
  0x20   : > { %1061 = vmatprep.mubr.msk.f32.mxu0 %vm442_vm1, %v423_v25  ;;  %1125 = vmatpush3.bf16.msra.mxu0 %v1122_v24  ;;  %v426_v47 = vmul.f32 %v422_v46, %v418_v45  ;;  %s1214_s14 = scalar_lea.vmem %s1519_s30, 16  ;;  %p1221_p0 = scmp.lt.s32.totalorder %s1519_s30, %s1219_s19 }
  0x21   : > { %1127 = vmatprep.subr.bf16.mxu0 %v1126_v28  ;;  %1080 = vmatmul.mubr.msk.f32.vlgmr.msra.gmra.mrb[0].mxu1 %vm540_vm0, %v406_v31  ;;  %v773_v31 = vlaneseq  ;;  %p1215_p11 = scmp.ne.s32.totalorder %s1519_s30, %s1214_s14  ;;  %p1222_p1 = scmp.lt.s32.totalorder %s1220_s21, %s1214_s14 }
  0x22   : > { %1082 = vmatprep.mubr.msk.f32.mxu1 %vm540_vm0, %v407_v32  ;;  %1153 = vmatpush3.bf16.msra.mxu1 %v1150_v50 }
  0x23   : > { %1155 = vmatprep.subr.bf16.mxu1 %v1154_v53  ;;  %v774_v32 = vshrl.u32 %v773_v31, 7  ;;  %p1216_p12 = pnand %p1215_p11, %p1379_p5  ;;  %p1223_p2 = por %p1222_p1, %p1221_p0 }
  0x24   : > { %1129 = vmatpush3.bf16.msra.mxu0 %v1126_v28 }
  0x25   : > { %1131 = vmatprep.subr.bf16.mxu0 %v1130_v33  ;;  %1083 = vmatmul.mubr.msk.f32.gmra.mrb[2].mxu1 %vm540_vm0, %v408_v36  ;;  %p1217_p13 = pneg %p1216_p12 }
  0x26   : > { %1157 = vmatpush3.bf16.msra.mxu1 %v1154_v53 }
  0x27   : > { %1158 = vmatprep.subr.bf16.mxu1 %v1278_v11  ;;  %p1224_p3 = pnand %p1223_p2, %p1217_p13 }
  0x28   : > { %1133 = vmatpush3.bf16.msra.mxu0 %v1130_v33  ;;  %v775_v33 = vsub.s32 0, %v774_v32 }
  0x29   : > { %1135 = vmatprep.subr.bf16.mxu0 %v1134_v37 }
  0x2c   : > { %1137 = vmatpush3.bf16.msra.mxu0 %v1134_v37 }
  0x2d   : > { %1059 = vmatprep.subr.mxu0 %v441_v38 }
  0x30   : > { %1060 = vmatpush3.msra.mxu0 %v441_v38 }
  0x31   : > { %1062 = vmatmul.mubr.msk.f32.vlgmr.msra.gmra.mrb[0].mxu0 %vm442_vm1, %v424_v43 }
  0x32   : > { %1064 = vmatprep.mubr.msk.f32.mxu0 %vm442_vm1, %v425_v44 }
  0x35   : > { %1065 = vmatmul.mubr.msk.f32.gmra.mrb[2].mxu0 %vm442_vm1, %v426_v47 }
  0x9e   : > { %v771_v34 = vpop.permute.xlu0 %770 }
  0x9f   : > { %v776_v35 = vrot.slane %v771_v34, %v775_v33 }
  0xf4   : > { %v1081_v54 = vpop.f32.mrb[0].mxu1 }
  0xf5   : > { %v619_v55 = vpop.f32.mrb[1].mxu1 }
  0xf8   : > { %v1084_v56 = vpop.f32.mrb[2].mxu1 }
  0xf9   : > { %v629_v57 = vpop.f32.mrb[3].mxu1 }
 0x104   : > { %v1063_v58 = vpop.f32.mrb[0].mxu0 }
 0x105   : > { %v625_v60 = vadd.f32 %v1081_v54, %v1063_v58  ;;  %v521_v61 = vpop.f32.mrb[1].mxu0 }
 0x106   : > { %v620_v62 = vadd.f32 %v619_v55, %v521_v61 }
 0x107   : > { %v646_v63 = vadd.f32 %v975_v59, %v625_v60 }
 0x108   : > { %v645_v0 = vadd.f32 %v975_v59, %v620_v62  ;;  %v1066_v1 = vpop.f32.mrb[2].mxu0 }
 0x109   : > { %v635_v2 = vadd.f32 %v1084_v56, %v1066_v1  ;;  %v531_v3 = vpop.f32.mrb[3].mxu0  ;;  %v650_v6 = vmax.f32 %v646_v63, 0.0 }
 0x10a   : > { %v649_v4 = vmax.f32 %v645_v0, 0.0  ;;  %v630_v5 = vadd.f32 %v629_v57, %v531_v3 }
 0x10b   : > { %v648_v7 = vadd.f32 %v975_v59, %v635_v2 }
 0x10c   : > { %v647_v8 = vadd.f32 %v975_v59, %v630_v5  ;;  %1093 = vmatprep.mubr.msk.f32.mxu1 %vm664_vm2, %v649_v4 }
 0x10d   : > { %v652_v9 = vmax.f32 %v648_v7, 0.0  ;;  %1094 = vmatmul.mubr.msk.f32.vlgmr.msra.gmra.mrb[4].mxu1 %vm664_vm2, %v650_v6 }
 0x10e   : > { %v651_v10 = vmax.f32 %v647_v8, 0.0 }
 0x110   : > { %1096 = vmatprep.mubr.msk.f32.mxu1 %vm664_vm2, %v651_v10 }
 0x111   : > { %1097 = vmatmul.mubr.msk.f32.gmra.mrb[6].mxu1 %vm664_vm2, %v652_v9 }
 0x112   : > { %1107 = vmatprep.mubr.msk.f32.mxu1 %vm1279_vm3, %v1280_v12 }
 0x1e0   : > { %v1095_v16 = vpop.f32.mrb[4].mxu1 }
 0x1e1   : > { %v749_v17 = vadd.f32 %v1095_v16, %v976_v15  ;;  %v743_v18 = vpop.f32.mrb[5].mxu1 }
 0x1e2   : > { %v744_v19 = vadd.f32 %v976_v15, %v743_v18 }
 0x1e3   : > { %v763_v20 = vmax.f32 %v749_v17, 0.0 }
 0x1e4   : > { %v762_v21 = vmax.f32 %v744_v19, 0.0  ;;  %v1098_v22 = vpop.f32.mrb[6].mxu1 }
 0x1e5   : > { %v759_v23 = vadd.f32 %v1098_v22, %v976_v15  ;;  %v753_v24 = vpop.f32.mrb[7].mxu1 }
 0x1e6   : > { %v1159_v25 = vpack.c.bf16 %v763_v20, %v762_v21  ;;  %v754_v26 = vadd.f32 %v976_v15, %v753_v24 }
 0x1e7   : > { %v765_v27 = vmax.f32 %v759_v23, 0.0 }
 0x1e8   : > { %v764_v28 = vmax.f32 %v754_v26, 0.0  ;;  %1161 = vmatpush3.bf16.xpose.msk.msra.mxu1 %vm1160_vm5, %v1159_v25 }
 0x1e9   : > { %1162 = vmatprep.subr.bf16.mxu1 %v1278_v11 }
 0x1ea   : > { %v1163_v29 = vpack.c.bf16 %v765_v27, %v764_v28 }
 0x1f0   : > { %1165 = vmatpush3.bf16.xpose.msk.msra.mxu1 %vm1160_vm5, %v1163_v29 }
 0x1f7   : > { %1108 = vmatmul.mubr.msk.f32.vlgmr.msra.gmra.mrb[8].mxu1 %vm777_vm4, %v766_v30 }
 0x2ca   : > { %v859_v36 = vpop.f32.mrb[8].mxu1 }
 0x2cb   : > { %v860_v37 = vadd.f32 %v859_v36, %v776_v35  ;;  %v1109_v38 = vpop.f32.mrb[9].mxu1 }
 0x2cd   : > { %864 = vst.msk [vmem:[%s386_s27] sm:$0x1] %vm863_vm6, %v860_v37 }
 0x2ce   : > { %1227 = shalt.err (!%p1224_p3)
}
 0x2cf   : > { %s1228_s12 = scalar_lea.hbm %s1517_s13, 16  ;;  %s1232_s27 = scalar_lea.hbm %s1569_s10, 32 }
 0x2d0   : > { %p1229_p4 = scmp.ne.s32.totalorder %s1517_s13, %s1228_s12  ;;  %p1233_p9 = scmp.lt.u32.totalorder %s1517_s13, %s1569_s10 }
 0x2d1   : > { %p1234_p10 = scmp.lt.u32.totalorder %s1232_s27, %s1228_s12  ;;  %p1236_p12 = scmp.lt.u32.totalorder %s1228_s12, %s1517_s13 }
 0x2d2   : > { %p1230_p7 = pnand %p1229_p4, %p1379_p5 }
 0x2d3   : > { %p1235_p11 = por %p1234_p10, %p1233_p9 }
 0x2d4   : > { %p1231_p8 = pneg %p1230_p7 }
 0x2d5   : > { %p1237_p13 = por %p1236_p12, %p1235_p11 }
 0x2d7   : > { %p1238_p0 = pnand %p1237_p13, %p1231_p8 }
 0x2d9   : > { %1241 = shalt.err (!%p1238_p0)
}
 0x2da   : > { %1170 = dma.vmem_to_hbm [thread:$0]  (%p1379_p5), %s1519_s30, 16, %s1517_s13, %s866_s26  }
 0x2db PF: > { %p1176_p1 = scmp.ge.s32.totalorder %s1276_s18, 2  ;;  %s890_s14 = sand.u32 1, %s1264_s15  }
 0x2dc   : > { %s891_s9 = scalar_lea.sflag [#allocation4], %s890_s14 }
 0x2dd   : > { %p1173_p2 = pnand %p1176_p1, %p1383_p6 }
 0x2df   : > { %1259 = dma.done.wait (!%p1173_p2), %s891_s9, 16  }
 0x2e0   : > { %1261 = vsyncadd (!%p1173_p2), %s891_s9, 4294967280  ;;  %p22_p3 = scmp.ge.s32.totalorder %s1366_s20, 4   ;;  %s1572_s15 = smov %s1268_s16 }
 0x2e1   : > { %s1573_s16 = smov %s1272_s17  ;;  %s1574_s17 = smov %s1377_s23 }
 0x2e2   : > { %s1575_s18 = smov %s1366_s20  ;;  %24 = sbr.rel (!%p22_p3) target bundleno = 6 (0x6), region = 101 }
 0x2e9   :  { %895 = vsyncpa [#allocation4], 1 }
 0x2ea   :  { %897 = vsyncpa [#allocation4 + $0x1], 1 }

</bundles_post_ra>
